<compile_context>
chip_gen: v6e
topology: v6e:2x2x1
jax: 0.10.0
libtpu: 0.0.40
codegen_flags: <defaults>
</compile_context>

<pallas_src>
import jax
import jax.numpy as jnp
from jax.experimental import pallas as pl
from jax.experimental.pallas import tpu as pltpu


def _lstm_recurrence_kernel(gx_ref, whh_ref, h_out_ref, h_scr, c_scr):
    """One grid step == one (batch block, time block) of the LSTM recurrence.

    gx_ref   : (Tblk, Bblk, 4H) bf16   precomputed x@W_ih^T + bias for this block
    whh_ref  : (H, 4H)                 hidden->gates weights (transposed PyTorch W_hh)
    h_out_ref: (Tblk, Bblk, H)  bf16   emitted hidden states for this block
    h_scr, c_scr : (Bblk, H) f32       recurrent state (persist across time blocks)
    """
    # Re-initialise state at the first time block of every batch block.
    @pl.when(pl.program_id(1) == 0)
    def _init():
        h_scr[...] = jnp.zeros_like(h_scr)
        c_scr[...] = jnp.zeros_like(c_scr)

    H = h_scr.shape[-1]
    t_blk = gx_ref.shape[0]

    # Hoist the weight load out of the inner loop.  For H >= 128 the wrapper
    # passes W_hh in bf16 (bf16-native MXU on v6e/v7x); h is cast per-step but
    # the carries and the gate accumulation stay f32.
    w_hh = whh_ref[...]
    rec_dtype = w_hh.dtype

    def step(t, carry):
        h, c = carry
        gates = (gx_ref[t].astype(jnp.float32)
                 + jnp.dot(h.astype(rec_dtype), w_hh,
                           preferred_element_type=jnp.float32))
        if 4 * H <= 128:
            # Gates fit in one vreg width: two full-width EUP ops instead of
            # four quarter-filled ones; slices/selects ride on VPU/XLU slack.
            sig = jax.nn.sigmoid(gates)
            tnh = jnp.tanh(gates)
            i_g = sig[:, 0 * H:1 * H]
            f_g = sig[:, 1 * H:2 * H]
            g_g = tnh[:, 2 * H:3 * H]
            o_g = sig[:, 3 * H:4 * H]
        else:
            i_g = jax.nn.sigmoid(gates[:, 0 * H:1 * H])
            f_g = jax.nn.sigmoid(gates[:, 1 * H:2 * H])
            g_g = jnp.tanh(gates[:, 2 * H:3 * H])
            o_g = jax.nn.sigmoid(gates[:, 3 * H:4 * H])
        c_new = f_g * c + i_g * g_g
        h_new = o_g * jnp.tanh(c_new)
        h_out_ref[t] = h_new.astype(h_out_ref.dtype)
        return h_new, c_new

    h_fin, c_fin = jax.lax.fori_loop(
        0, t_blk, step, (h_scr[...], c_scr[...]), unroll=min(t_blk, 32))
    h_scr[...] = h_fin
    c_scr[...] = c_fin


def _tile_bytes(shape, itemsize):
    """Bytes of a VMEM tile after (sublane, lane) padding (8*4/itemsize, 128)."""
    *lead, sl, ln = shape
    sub_mult = 8 * (4 // itemsize)
    sl_p = -(-sl // sub_mult) * sub_mult
    ln_p = -(-ln // 128) * 128
    n = 1
    for d in lead:
        n *= d
    return n * sl_p * ln_p * itemsize


def etc_lstm_forward(x, lengths, params, *, time_block=256, max_len=None):
    """x: (B, S, F) float32, lengths: (B,) int32.

    Returns (B, max_len or S, 2). Pass max_len = max(lengths) (a static Python
    int) to reproduce pad_packed_sequence truncation without a host sync.
    """
    B, S, F = x.shape
    H = params["w_hh"].shape[0] // 4                       # w_hh is (4H, H)

    stream_dtype = jnp.bfloat16                            # HBM<->VMEM streaming dtype
    # bf16 recurrent-matmul operands only pay off (and only matter) at larger H;
    # at small H the recurrent dot is latency-bound, keep f32 operands.
    rec_dtype = jnp.bfloat16 if H >= 128 else jnp.float32

    # --- batch padding / blocking -------------------------------------------
    # NOTE: throughput scales almost linearly with extra batch rows until the
    # MXU LHS rows fill up (128 on v5e, 256 on v6e/v7x) — stack independent
    # sequences in the caller if possible.
    if B >= 16:
        # Split the batch into 2 "parallel" blocks so v7x can use both TCs.
        # Pad to a multiple of 32 so each block keeps bf16-friendly sublanes.
        B_pad = -(-B // 32) * 32
        B_blk = B_pad // 2
    else:
        B_pad = -(-B // 8) * 8
        B_blk = B_pad
    n_b = B_pad // B_blk

    # --- time blocking sized against an explicit, padding-aware VMEM budget --
    stream_isz = jnp.dtype(stream_dtype).itemsize
    rec_isz = jnp.dtype(rec_dtype).itemsize
    per_t_bytes = 2 * (_tile_bytes((1, B_blk, 4 * H), stream_isz)     # gx (dbl-buf)
                       + _tile_bytes((1, B_blk, H), stream_isz))      # h_out (dbl-buf)
    fixed_bytes = (2 * _tile_bytes((H, 4 * H), rec_isz)               # W_hh (dbl-buf)
                   + 2 * _tile_bytes((B_blk, H), 4))                  # h/c scratch
    vmem_block_budget = 20 * 1024 * 1024                              # < 32 MiB limit
    t_cap = max(1, (vmem_block_budget - fixed_bytes) // per_t_bytes)
    t_blk = max(1, min(time_block, S, t_cap))
    S_pad = pl.cdiv(S, t_blk) * t_blk

    # --- non-recurrent projection hoisted into XLA ---------------------------
    # Produced directly time-major and pre-padded; bf16 operands, f32 accumulation.
    x_pad = jnp.pad(x.astype(jnp.float32),
                    ((0, B_pad - B), (0, S_pad - S), (0, 0)))
    bias = (params["b_ih"] + params["b_hh"]).astype(jnp.float32)
    gates_x = jnp.einsum("bsf,gf->sbg",
                         x_pad.astype(jnp.bfloat16),
                         params["w_ih"].astype(jnp.bfloat16),
                         preferred_element_type=jnp.float32)          # (S_pad,B_pad,4H)
    gx = (gates_x + bias).astype(stream_dtype)

    w_hh_t = params["w_hh"].T.astype(rec_dtype)                       # (H, 4H)

    # --- serial recurrence in Pallas ------------------------------------------
    h_seq = pl.pallas_call(
        _lstm_recurrence_kernel,
        grid=(n_b, S_pad // t_blk),
        in_specs=[
            pl.BlockSpec((t_blk, B_blk, 4 * H), lambda b, t: (t, b, 0)),  # gates_x
            pl.BlockSpec((H, 4 * H), lambda b, t: (0, 0)),                # W_hh^T
        ],
        out_specs=pl.BlockSpec((t_blk, B_blk, H), lambda b, t: (t, b, 0)),
        out_shape=jax.ShapeDtypeStruct((S_pad, B_pad, H), stream_dtype),
        scratch_shapes=[
            pltpu.VMEM((B_blk, H), jnp.float32),            # h state
            pltpu.VMEM((B_blk, H), jnp.float32),            # c state
        ],
        compiler_params=pltpu.CompilerParams(
            # batch blocks are independent (v7x: one per TensorCore);
            # the time axis is a sequential recurrence.
            dimension_semantics=("parallel", "arbitrary"),
            vmem_limit_bytes=32 * 1024 * 1024),
    )(gx, w_hh_t)

    # --- mask + output head in XLA (time-major end to end) -------------------
    h_seq = h_seq[:S, :B, :].astype(jnp.float32)            # drop padding
    mask = (jnp.arange(S)[:, None, None] < lengths[None, :, None]).astype(jnp.float32)
    s = h_seq * mask                                        # pad_packed zeroing
    # Dropout is identity in eval mode.
    out = jax.nn.sigmoid(
        jnp.einsum("sbh,oh->sbo", s, params["w_out"]) + params["b_out"])
    out = jnp.transpose(out, (1, 0, 2))                     # (B, S, 2) — cheap (2-wide)
    if max_len is not None:
        out = out[:, :max_len, :]
    return out


def _reference_forward(x, lengths, params, *, max_len=None):
    """Pure-JAX reference matching the PyTorch module (eval mode), full f32."""
    B, S, F = x.shape
    H = params["w_hh"].shape[0] // 4
    hp = jax.lax.Precision.HIGHEST                          # scoped, not global
    w_ih_t, w_hh_t = params["w_ih"].T, params["w_hh"].T
    bias = params["b_ih"] + params["b_hh"]

    def step(carry, x_t):
        h, c = carry
        gates = (jnp.dot(x_t, w_ih_t, precision=hp)
                 + jnp.dot(h, w_hh_t, precision=hp) + bias)
        i, f, g, o = (jax.nn.sigmoid(gates[:, :H]),
                      jax.nn.sigmoid(gates[:, H:2 * H]),
                      jnp.tanh(gates[:, 2 * H:3 * H]),
                      jax.nn.sigmoid(gates[:, 3 * H:]))
        c = f * c + i * g
        h = o * jnp.tanh(c)
        return (h, c), h

    h0 = jnp.zeros((B, H), jnp.float32)
    _, hs = jax.lax.scan(step, (h0, h0), jnp.transpose(x, (1, 0, 2)))
    hs = jnp.transpose(hs, (1, 0, 2))                       # (B, S, H)
    mask = (jnp.arange(S)[None, :, None] < lengths[:, None, None]).astype(jnp.float32)
    s = hs * mask
    out = jax.nn.sigmoid(
        jnp.einsum("bsh,oh->bso", s, params["w_out"], precision=hp) + params["b_out"])
    if max_len is not None:
        out = out[:, :max_len, :]
    return out


def init_params(key, input_size, hidden_dim):
    """Deterministic init mirroring PyTorch's LSTM/Linear uniform(-1/sqrt(H), 1/sqrt(H))."""
    ks = jax.random.split(key, 6)
    bound = 1.0 / jnp.sqrt(hidden_dim)
    u = lambda k, shape, b: jax.random.uniform(k, shape, jnp.float32, -b, b)
    return {
        "w_ih": u(ks[0], (4 * hidden_dim, input_size), bound),
        "w_hh": u(ks[1], (4 * hidden_dim, hidden_dim), bound),
        "b_ih": u(ks[2], (4 * hidden_dim,), bound),
        "b_hh": u(ks[3], (4 * hidden_dim,), bound),
        "w_out": u(ks[4], (2, hidden_dim), bound),
        "b_out": u(ks[5], (2,), bound),
    }


if __name__ == "__main__":
    B, S, F, H = 2, 8, 16, 32

    key = jax.random.PRNGKey(0)
    k_x, k_p = jax.random.split(key)
    x = jax.random.normal(k_x, (B, S, F), jnp.float32)
    lengths_list = [8, 5]                                   # max(lengths) == S
    lengths = jnp.array(lengths_list, jnp.int32)
    params = init_params(k_p, F, H)
    max_len = max(lengths_list)                             # static, no device_get

    fwd = jax.jit(etc_lstm_forward, static_argnames=("time_block", "max_len"))
    out = fwd(x, lengths, params, max_len=max_len)
    out = jax.block_until_ready(out)

    ref = _reference_forward(x, lengths, params, max_len=max_len)
    assert out.shape == ref.shape == (B, max_len, 2), out.shape
    # Tolerance accounts for bf16 streaming of gates_x / h_out (f32 state & accum
    # inside the kernel); outputs are post-sigmoid, so 1e-2 absolute is tight
    # enough to catch any structural error.
    err = float(jnp.max(jnp.abs(out - ref)))
    assert err < 1e-2, err

    print("KERNEL_OK")
</pallas_src>

<mosaic_0001>
module attributes {stable_mosaic.version = 11 : i64} {
  func.func @_lstm_recurrence_kernel(%arg0: i32, %arg1: i32, %arg2: memref<8x8x128xbf16, #tpu.memory_space<vmem>>, %arg3: memref<32x128xf32, #tpu.memory_space<vmem>>, %arg4: memref<8x8x32xbf16, #tpu.memory_space<vmem>>, %arg5: memref<8x32xf32, #tpu.memory_space<vmem>>, %arg6: memref<8x32xf32, #tpu.memory_space<vmem>>) attributes {dimension_semantics = [#tpu.dimension_semantics<parallel>, #tpu.dimension_semantics<arbitrary>], iteration_bounds = array<i64: 1, 1>, scalar_prefetch = 0 : i64, scratch_operands = 2 : i64, tpu.core_type = #tpu.core_type<tc>, window_params = [{transform_indices = @transform_0, window_bounds = array<i64: 8, 8, 128>}, {pipeline_mode = #tpu.pipeline_mode<synchronous>, transform_indices = @transform_1, window_bounds = array<i64: 32, 128>}, {transform_indices = @transform_2, window_bounds = array<i64: 8, 8, 32>}]} {
    %c0_i32 = arith.constant 0 : i32
    %0 = arith.cmpi eq, %arg1, %c0_i32 : i32
    %1 = arith.extui %0 : i1 to i32
    %c0_i32_0 = arith.constant 0 : i32
    %2 = arith.cmpi ne, %1, %c0_i32_0 : i32
    scf.if %2 {
      %cst_58 = arith.constant 0.000000e+00 : f32
      %216 = vector.broadcast %cst_58 : f32 to vector<8x32xf32>
      %c0_59 = arith.constant 0 : index
      %c0_60 = arith.constant 0 : index
      %217 = vector.load %arg5[%c0_59, %c0_60] : memref<8x32xf32, #tpu.memory_space<vmem>>, vector<8x32xf32>
      tpu.vector_store %arg5[%c0_59, %c0_60], %216 {strides = array<i32>} : memref<8x32xf32, #tpu.memory_space<vmem>>, vector<8x32xf32>,
      %cst_61 = arith.constant 0.000000e+00 : f32
      %218 = vector.broadcast %cst_61 : f32 to vector<8x32xf32>
      %c0_62 = arith.constant 0 : index
      %c0_63 = arith.constant 0 : index
      %219 = vector.load %arg6[%c0_62, %c0_63] : memref<8x32xf32, #tpu.memory_space<vmem>>, vector<8x32xf32>
      tpu.vector_store %arg6[%c0_62, %c0_63], %218 {strides = array<i32>} : memref<8x32xf32, #tpu.memory_space<vmem>>, vector<8x32xf32>,
    } else {
    }
    %c0 = arith.constant 0 : index
    %c0_1 = arith.constant 0 : index
    %3 = vector.load %arg3[%c0, %c0_1] : memref<32x128xf32, #tpu.memory_space<vmem>>, vector<32x128xf32>
    %c0_2 = arith.constant 0 : index
    %c0_3 = arith.constant 0 : index
    %4 = vector.load %arg5[%c0_2, %c0_3] : memref<8x32xf32, #tpu.memory_space<vmem>>, vector<8x32xf32>
    %c0_4 = arith.constant 0 : index
    %c0_5 = arith.constant 0 : index
    %5 = vector.load %arg6[%c0_4, %c0_5] : memref<8x32xf32, #tpu.memory_space<vmem>>, vector<8x32xf32>
    %c0_i32_6 = arith.constant 0 : i32
    %6 = arith.index_cast %c0_i32_6 : i32 to index
    %c0_7 = arith.constant 0 : index
    %c0_8 = arith.constant 0 : index
    %7 = vector.load %arg2[%6, %c0_7, %c0_8] : memref<8x8x128xbf16, #tpu.memory_space<vmem>>, vector<1x8x128xbf16>
    %8 = vector.shape_cast %7 : vector<1x8x128xbf16> to vector<8x128xbf16>
    %9 = arith.extf %8 : vector<8x128xbf16> to vector<8x128xf32>
    %cst = arith.constant dense<0.000000e+00> : vector<8x128xf32>
    %10 = tpu.matmul %4, %3, %cst {dimension_numbers = #tpu.dot_dimension_numbers<[1], [0], [0], [1], [0, 0, 1, 1], [], []>} : vector<8x32xf32>, vector<32x128xf32>, vector<8x128xf32> -> vector<8x128xf32>
    %11 = arith.addf %9, %10 : vector<8x128xf32>
    %12 = arith.negf %11 : vector<8x128xf32>
    %13 = math.exp %12 : vector<8x128xf32>
    %cst_9 = arith.constant 1.000000e+00 : f32
    %14 = vector.broadcast %cst_9 : f32 to vector<8x128xf32>
    %15 = arith.addf %14, %13 : vector<8x128xf32>
    %16 = arith.divf %14, %15 : vector<8x128xf32>
    %17 = math.tanh %11 : vector<8x128xf32>
    %18 = vector.extract_strided_slice %16 {offsets = [0, 0], sizes = [8, 32], strides = [1, 1]} : vector<8x128xf32> to vector<8x32xf32>
    %19 = vector.extract_strided_slice %16 {offsets = [0, 32], sizes = [8, 32], strides = [1, 1]} : vector<8x128xf32> to vector<8x32xf32>
    %20 = vector.extract_strided_slice %17 {offsets = [0, 64], sizes = [8, 32], strides = [1, 1]} : vector<8x128xf32> to vector<8x32xf32>
    %21 = vector.extract_strided_slice %16 {offsets = [0, 96], sizes = [8, 32], strides = [1, 1]} : vector<8x128xf32> to vector<8x32xf32>
    %22 = arith.mulf %19, %5 : vector<8x32xf32>
    %23 = arith.mulf %18, %20 : vector<8x32xf32>
    %24 = arith.addf %22, %23 : vector<8x32xf32>
    %25 = math.tanh %24 : vector<8x32xf32>
    %26 = arith.mulf %21, %25 : vector<8x32xf32>
    %27 = arith.truncf %26 : vector<8x32xf32> to vector<8x32xbf16>
    %28 = arith.index_cast %c0_i32_6 : i32 to index
    %c0_10 = arith.constant 0 : index
    %c0_11 = arith.constant 0 : index
    %29 = vector.load %arg4[%28, %c0_10, %c0_11] : memref<8x8x32xbf16, #tpu.memory_space<vmem>>, vector<1x8x32xbf16>
    %30 = vector.shape_cast %29 : vector<1x8x32xbf16> to vector<8x32xbf16>
    %31 = vector.shape_cast %27 : vector<8x32xbf16> to vector<1x8x32xbf16>
    tpu.vector_store %arg4[%28, %c0_10, %c0_11], %31 {strides = array<i32>} : memref<8x8x32xbf16, #tpu.memory_space<vmem>>, vector<1x8x32xbf16>,
    %c1_i32 = arith.constant 1 : i32
    %32 = arith.index_cast %c1_i32 : i32 to index
    %c0_12 = arith.constant 0 : index
    %c0_13 = arith.constant 0 : index
    %33 = vector.load %arg2[%32, %c0_12, %c0_13] : memref<8x8x128xbf16, #tpu.memory_space<vmem>>, vector<1x8x128xbf16>
    %34 = vector.shape_cast %33 : vector<1x8x128xbf16> to vector<8x128xbf16>
    %35 = arith.extf %34 : vector<8x128xbf16> to vector<8x128xf32>
    %cst_14 = arith.constant dense<0.000000e+00> : vector<8x128xf32>
    %36 = tpu.matmul %26, %3, %cst_14 {dimension_numbers = #tpu.dot_dimension_numbers<[1], [0], [0], [1], [0, 0, 1, 1], [], []>} : vector<8x32xf32>, vector<32x128xf32>, vector<8x128xf32> -> vector<8x128xf32>
    %37 = arith.addf %35, %36 : vector<8x128xf32>
    %38 = arith.negf %37 : vector<8x128xf32>
    %39 = math.exp %38 : vector<8x128xf32>
    %cst_15 = arith.constant 1.000000e+00 : f32
    %40 = vector.broadcast %cst_15 : f32 to vector<8x128xf32>
    %41 = arith.addf %40, %39 : vector<8x128xf32>
    %42 = arith.divf %40, %41 : vector<8x128xf32>
    %43 = math.tanh %37 : vector<8x128xf32>
    %44 = vector.extract_strided_slice %42 {offsets = [0, 0], sizes = [8, 32], strides = [1, 1]} : vector<8x128xf32> to vector<8x32xf32>
    %45 = vector.extract_strided_slice %42 {offsets = [0, 32], sizes = [8, 32], strides = [1, 1]} : vector<8x128xf32> to vector<8x32xf32>
    %46 = vector.extract_strided_slice %43 {offsets = [0, 64], sizes = [8, 32], strides = [1, 1]} : vector<8x128xf32> to vector<8x32xf32>
    %47 = vector.extract_strided_slice %42 {offsets = [0, 96], sizes = [8, 32], strides = [1, 1]} : vector<8x128xf32> to vector<8x32xf32>
    %48 = arith.mulf %45, %24 : vector<8x32xf32>
    %49 = arith.mulf %44, %46 : vector<8x32xf32>
    %50 = arith.addf %48, %49 : vector<8x32xf32>
    %51 = math.tanh %50 : vector<8x32xf32>
    %52 = arith.mulf %47, %51 : vector<8x32xf32>
    %53 = arith.truncf %52 : vector<8x32xf32> to vector<8x32xbf16>
    %54 = arith.index_cast %c1_i32 : i32 to index
    %c0_16 = arith.constant 0 : index
    %c0_17 = arith.constant 0 : index
    %55 = vector.load %arg4[%54, %c0_16, %c0_17] : memref<8x8x32xbf16, #tpu.memory_space<vmem>>, vector<1x8x32xbf16>
    %56 = vector.shape_cast %55 : vector<1x8x32xbf16> to vector<8x32xbf16>
    %57 = vector.shape_cast %53 : vector<8x32xbf16> to vector<1x8x32xbf16>
    tpu.vector_store %arg4[%54, %c0_16, %c0_17], %57 {strides = array<i32>} : memref<8x8x32xbf16, #tpu.memory_space<vmem>>, vector<1x8x32xbf16>,
    %c2_i32 = arith.constant 2 : i32
    %58 = arith.index_cast %c2_i32 : i32 to index
    %c0_18 = arith.constant 0 : index
    %c0_19 = arith.constant 0 : index
    %59 = vector.load %arg2[%58, %c0_18, %c0_19] : memref<8x8x128xbf16, #tpu.memory_space<vmem>>, vector<1x8x128xbf16>
    %60 = vector.shape_cast %59 : vector<1x8x128xbf16> to vector<8x128xbf16>
    %61 = arith.extf %60 : vector<8x128xbf16> to vector<8x128xf32>
    %cst_20 = arith.constant dense<0.000000e+00> : vector<8x128xf32>
    %62 = tpu.matmul %52, %3, %cst_20 {dimension_numbers = #tpu.dot_dimension_numbers<[1], [0], [0], [1], [0, 0, 1, 1], [], []>} : vector<8x32xf32>, vector<32x128xf32>, vector<8x128xf32> -> vector<8x128xf32>
    %63 = arith.addf %61, %62 : vector<8x128xf32>
    %64 = arith.negf %63 : vector<8x128xf32>
    %65 = math.exp %64 : vector<8x128xf32>
    %cst_21 = arith.constant 1.000000e+00 : f32
    %66 = vector.broadcast %cst_21 : f32 to vector<8x128xf32>
    %67 = arith.addf %66, %65 : vector<8x128xf32>
    %68 = arith.divf %66, %67 : vector<8x128xf32>
    %69 = math.tanh %63 : vector<8x128xf32>
    %70 = vector.extract_strided_slice %68 {offsets = [0, 0], sizes = [8, 32], strides = [1, 1]} : vector<8x128xf32> to vector<8x32xf32>
    %71 = vector.extract_strided_slice %68 {offsets = [0, 32], sizes = [8, 32], strides = [1, 1]} : vector<8x128xf32> to vector<8x32xf32>
    %72 = vector.extract_strided_slice %69 {offsets = [0, 64], sizes = [8, 32], strides = [1, 1]} : vector<8x128xf32> to vector<8x32xf32>
    %73 = vector.extract_strided_slice %68 {offsets = [0, 96], sizes = [8, 32], strides = [1, 1]} : vector<8x128xf32> to vector<8x32xf32>
    %74 = arith.mulf %71, %50 : vector<8x32xf32>
    %75 = arith.mulf %70, %72 : vector<8x32xf32>
    %76 = arith.addf %74, %75 : vector<8x32xf32>
    %77 = math.tanh %76 : vector<8x32xf32>
    %78 = arith.mulf %73, %77 : vector<8x32xf32>
    %79 = arith.truncf %78 : vector<8x32xf32> to vector<8x32xbf16>
    %80 = arith.index_cast %c2_i32 : i32 to index
    %c0_22 = arith.constant 0 : index
    %c0_23 = arith.constant 0 : index
    %81 = vector.load %arg4[%80, %c0_22, %c0_23] : memref<8x8x32xbf16, #tpu.memory_space<vmem>>, vector<1x8x32xbf16>
    %82 = vector.shape_cast %81 : vector<1x8x32xbf16> to vector<8x32xbf16>
    %83 = vector.shape_cast %79 : vector<8x32xbf16> to vector<1x8x32xbf16>
    tpu.vector_store %arg4[%80, %c0_22, %c0_23], %83 {strides = array<i32>} : memref<8x8x32xbf16, #tpu.memory_space<vmem>>, vector<1x8x32xbf16>,
    %c3_i32 = arith.constant 3 : i32
    %84 = arith.index_cast %c3_i32 : i32 to index
    %c0_24 = arith.constant 0 : index
    %c0_25 = arith.constant 0 : index
    %85 = vector.load %arg2[%84, %c0_24, %c0_25] : memref<8x8x128xbf16, #tpu.memory_space<vmem>>, vector<1x8x128xbf16>
    %86 = vector.shape_cast %85 : vector<1x8x128xbf16> to vector<8x128xbf16>
    %87 = arith.extf %86 : vector<8x128xbf16> to vector<8x128xf32>
    %cst_26 = arith.constant dense<0.000000e+00> : vector<8x128xf32>
    %88 = tpu.matmul %78, %3, %cst_26 {dimension_numbers = #tpu.dot_dimension_numbers<[1], [0], [0], [1], [0, 0, 1, 1], [], []>} : vector<8x32xf32>, vector<32x128xf32>, vector<8x128xf32> -> vector<8x128xf32>
    %89 = arith.addf %87, %88 : vector<8x128xf32>
    %90 = arith.negf %89 : vector<8x128xf32>
    %91 = math.exp %90 : vector<8x128xf32>
    %cst_27 = arith.constant 1.000000e+00 : f32
    %92 = vector.broadcast %cst_27 : f32 to vector<8x128xf32>
    %93 = arith.addf %92, %91 : vector<8x128xf32>
    %94 = arith.divf %92, %93 : vector<8x128xf32>
    %95 = math.tanh %89 : vector<8x128xf32>
    %96 = vector.extract_strided_slice %94 {offsets = [0, 0], sizes = [8, 32], strides = [1, 1]} : vector<8x128xf32> to vector<8x32xf32>
    %97 = vector.extract_strided_slice %94 {offsets = [0, 32], sizes = [8, 32], strides = [1, 1]} : vector<8x128xf32> to vector<8x32xf32>
    %98 = vector.extract_strided_slice %95 {offsets = [0, 64], sizes = [8, 32], strides = [1, 1]} : vector<8x128xf32> to vector<8x32xf32>
    %99 = vector.extract_strided_slice %94 {offsets = [0, 96], sizes = [8, 32], strides = [1, 1]} : vector<8x128xf32> to vector<8x32xf32>
    %100 = arith.mulf %97, %76 : vector<8x32xf32>
    %101 = arith.mulf %96, %98 : vector<8x32xf32>
    %102 = arith.addf %100, %101 : vector<8x32xf32>
    %103 = math.tanh %102 : vector<8x32xf32>
    %104 = arith.mulf %99, %103 : vector<8x32xf32>
    %105 = arith.truncf %104 : vector<8x32xf32> to vector<8x32xbf16>
    %106 = arith.index_cast %c3_i32 : i32 to index
    %c0_28 = arith.constant 0 : index
    %c0_29 = arith.constant 0 : index
    %107 = vector.load %arg4[%106, %c0_28, %c0_29] : memref<8x8x32xbf16, #tpu.memory_space<vmem>>, vector<1x8x32xbf16>
    %108 = vector.shape_cast %107 : vector<1x8x32xbf16> to vector<8x32xbf16>
    %109 = vector.shape_cast %105 : vector<8x32xbf16> to vector<1x8x32xbf16>
    tpu.vector_store %arg4[%106, %c0_28, %c0_29], %109 {strides = array<i32>} : memref<8x8x32xbf16, #tpu.memory_space<vmem>>, vector<1x8x32xbf16>,
    %c4_i32 = arith.constant 4 : i32
    %110 = arith.index_cast %c4_i32 : i32 to index
    %c0_30 = arith.constant 0 : index
    %c0_31 = arith.constant 0 : index
    %111 = vector.load %arg2[%110, %c0_30, %c0_31] : memref<8x8x128xbf16, #tpu.memory_space<vmem>>, vector<1x8x128xbf16>
    %112 = vector.shape_cast %111 : vector<1x8x128xbf16> to vector<8x128xbf16>
    %113 = arith.extf %112 : vector<8x128xbf16> to vector<8x128xf32>
    %cst_32 = arith.constant dense<0.000000e+00> : vector<8x128xf32>
    %114 = tpu.matmul %104, %3, %cst_32 {dimension_numbers = #tpu.dot_dimension_numbers<[1], [0], [0], [1], [0, 0, 1, 1], [], []>} : vector<8x32xf32>, vector<32x128xf32>, vector<8x128xf32> -> vector<8x128xf32>
    %115 = arith.addf %113, %114 : vector<8x128xf32>
    %116 = arith.negf %115 : vector<8x128xf32>
    %117 = math.exp %116 : vector<8x128xf32>
    %cst_33 = arith.constant 1.000000e+00 : f32
    %118 = vector.broadcast %cst_33 : f32 to vector<8x128xf32>
    %119 = arith.addf %118, %117 : vector<8x128xf32>
    %120 = arith.divf %118, %119 : vector<8x128xf32>
    %121 = math.tanh %115 : vector<8x128xf32>
    %122 = vector.extract_strided_slice %120 {offsets = [0, 0], sizes = [8, 32], strides = [1, 1]} : vector<8x128xf32> to vector<8x32xf32>
    %123 = vector.extract_strided_slice %120 {offsets = [0, 32], sizes = [8, 32], strides = [1, 1]} : vector<8x128xf32> to vector<8x32xf32>
    %124 = vector.extract_strided_slice %121 {offsets = [0, 64], sizes = [8, 32], strides = [1, 1]} : vector<8x128xf32> to vector<8x32xf32>
    %125 = vector.extract_strided_slice %120 {offsets = [0, 96], sizes = [8, 32], strides = [1, 1]} : vector<8x128xf32> to vector<8x32xf32>
    %126 = arith.mulf %123, %102 : vector<8x32xf32>
    %127 = arith.mulf %122, %124 : vector<8x32xf32>
    %128 = arith.addf %126, %127 : vector<8x32xf32>
    %129 = math.tanh %128 : vector<8x32xf32>
    %130 = arith.mulf %125, %129 : vector<8x32xf32>
    %131 = arith.truncf %130 : vector<8x32xf32> to vector<8x32xbf16>
    %132 = arith.index_cast %c4_i32 : i32 to index
    %c0_34 = arith.constant 0 : index
    %c0_35 = arith.constant 0 : index
    %133 = vector.load %arg4[%132, %c0_34, %c0_35] : memref<8x8x32xbf16, #tpu.memory_space<vmem>>, vector<1x8x32xbf16>
    %134 = vector.shape_cast %133 : vector<1x8x32xbf16> to vector<8x32xbf16>
    %135 = vector.shape_cast %131 : vector<8x32xbf16> to vector<1x8x32xbf16>
    tpu.vector_store %arg4[%132, %c0_34, %c0_35], %135 {strides = array<i32>} : memref<8x8x32xbf16, #tpu.memory_space<vmem>>, vector<1x8x32xbf16>,
    %c5_i32 = arith.constant 5 : i32
    %136 = arith.index_cast %c5_i32 : i32 to index
    %c0_36 = arith.constant 0 : index
    %c0_37 = arith.constant 0 : index
    %137 = vector.load %arg2[%136, %c0_36, %c0_37] : memref<8x8x128xbf16, #tpu.memory_space<vmem>>, vector<1x8x128xbf16>
    %138 = vector.shape_cast %137 : vector<1x8x128xbf16> to vector<8x128xbf16>
    %139 = arith.extf %138 : vector<8x128xbf16> to vector<8x128xf32>
    %cst_38 = arith.constant dense<0.000000e+00> : vector<8x128xf32>
    %140 = tpu.matmul %130, %3, %cst_38 {dimension_numbers = #tpu.dot_dimension_numbers<[1], [0], [0], [1], [0, 0, 1, 1], [], []>} : vector<8x32xf32>, vector<32x128xf32>, vector<8x128xf32> -> vector<8x128xf32>
    %141 = arith.addf %139, %140 : vector<8x128xf32>
    %142 = arith.negf %141 : vector<8x128xf32>
    %143 = math.exp %142 : vector<8x128xf32>
    %cst_39 = arith.constant 1.000000e+00 : f32
    %144 = vector.broadcast %cst_39 : f32 to vector<8x128xf32>
    %145 = arith.addf %144, %143 : vector<8x128xf32>
    %146 = arith.divf %144, %145 : vector<8x128xf32>
    %147 = math.tanh %141 : vector<8x128xf32>
    %148 = vector.extract_strided_slice %146 {offsets = [0, 0], sizes = [8, 32], strides = [1, 1]} : vector<8x128xf32> to vector<8x32xf32>
    %149 = vector.extract_strided_slice %146 {offsets = [0, 32], sizes = [8, 32], strides = [1, 1]} : vector<8x128xf32> to vector<8x32xf32>
    %150 = vector.extract_strided_slice %147 {offsets = [0, 64], sizes = [8, 32], strides = [1, 1]} : vector<8x128xf32> to vector<8x32xf32>
    %151 = vector.extract_strided_slice %146 {offsets = [0, 96], sizes = [8, 32], strides = [1, 1]} : vector<8x128xf32> to vector<8x32xf32>
    %152 = arith.mulf %149, %128 : vector<8x32xf32>
    %153 = arith.mulf %148, %150 : vector<8x32xf32>
    %154 = arith.addf %152, %153 : vector<8x32xf32>
    %155 = math.tanh %154 : vector<8x32xf32>
    %156 = arith.mulf %151, %155 : vector<8x32xf32>
    %157 = arith.truncf %156 : vector<8x32xf32> to vector<8x32xbf16>
    %158 = arith.index_cast %c5_i32 : i32 to index
    %c0_40 = arith.constant 0 : index
    %c0_41 = arith.constant 0 : index
    %159 = vector.load %arg4[%158, %c0_40, %c0_41] : memref<8x8x32xbf16, #tpu.memory_space<vmem>>, vector<1x8x32xbf16>
    %160 = vector.shape_cast %159 : vector<1x8x32xbf16> to vector<8x32xbf16>
    %161 = vector.shape_cast %157 : vector<8x32xbf16> to vector<1x8x32xbf16>
    tpu.vector_store %arg4[%158, %c0_40, %c0_41], %161 {strides = array<i32>} : memref<8x8x32xbf16, #tpu.memory_space<vmem>>, vector<1x8x32xbf16>,
    %c6_i32 = arith.constant 6 : i32
    %162 = arith.index_cast %c6_i32 : i32 to index
    %c0_42 = arith.constant 0 : index
    %c0_43 = arith.constant 0 : index
    %163 = vector.load %arg2[%162, %c0_42, %c0_43] : memref<8x8x128xbf16, #tpu.memory_space<vmem>>, vector<1x8x128xbf16>
    %164 = vector.shape_cast %163 : vector<1x8x128xbf16> to vector<8x128xbf16>
    %165 = arith.extf %164 : vector<8x128xbf16> to vector<8x128xf32>
    %cst_44 = arith.constant dense<0.000000e+00> : vector<8x128xf32>
    %166 = tpu.matmul %156, %3, %cst_44 {dimension_numbers = #tpu.dot_dimension_numbers<[1], [0], [0], [1], [0, 0, 1, 1], [], []>} : vector<8x32xf32>, vector<32x128xf32>, vector<8x128xf32> -> vector<8x128xf32>
    %167 = arith.addf %165, %166 : vector<8x128xf32>
    %168 = arith.negf %167 : vector<8x128xf32>
    %169 = math.exp %168 : vector<8x128xf32>
    %cst_45 = arith.constant 1.000000e+00 : f32
    %170 = vector.broadcast %cst_45 : f32 to vector<8x128xf32>
    %171 = arith.addf %170, %169 : vector<8x128xf32>
    %172 = arith.divf %170, %171 : vector<8x128xf32>
    %173 = math.tanh %167 : vector<8x128xf32>
    %174 = vector.extract_strided_slice %172 {offsets = [0, 0], sizes = [8, 32], strides = [1, 1]} : vector<8x128xf32> to vector<8x32xf32>
    %175 = vector.extract_strided_slice %172 {offsets = [0, 32], sizes = [8, 32], strides = [1, 1]} : vector<8x128xf32> to vector<8x32xf32>
    %176 = vector.extract_strided_slice %173 {offsets = [0, 64], sizes = [8, 32], strides = [1, 1]} : vector<8x128xf32> to vector<8x32xf32>
    %177 = vector.extract_strided_slice %172 {offsets = [0, 96], sizes = [8, 32], strides = [1, 1]} : vector<8x128xf32> to vector<8x32xf32>
    %178 = arith.mulf %175, %154 : vector<8x32xf32>
    %179 = arith.mulf %174, %176 : vector<8x32xf32>
    %180 = arith.addf %178, %179 : vector<8x32xf32>
    %181 = math.tanh %180 : vector<8x32xf32>
    %182 = arith.mulf %177, %181 : vector<8x32xf32>
    %183 = arith.truncf %182 : vector<8x32xf32> to vector<8x32xbf16>
    %184 = arith.index_cast %c6_i32 : i32 to index
    %c0_46 = arith.constant 0 : index
    %c0_47 = arith.constant 0 : index
    %185 = vector.load %arg4[%184, %c0_46, %c0_47] : memref<8x8x32xbf16, #tpu.memory_space<vmem>>, vector<1x8x32xbf16>
    %186 = vector.shape_cast %185 : vector<1x8x32xbf16> to vector<8x32xbf16>
    %187 = vector.shape_cast %183 : vector<8x32xbf16> to vector<1x8x32xbf16>
    tpu.vector_store %arg4[%184, %c0_46, %c0_47], %187 {strides = array<i32>} : memref<8x8x32xbf16, #tpu.memory_space<vmem>>, vector<1x8x32xbf16>,
    %c7_i32 = arith.constant 7 : i32
    %188 = arith.index_cast %c7_i32 : i32 to index
    %c0_48 = arith.constant 0 : index
    %c0_49 = arith.constant 0 : index
    %189 = vector.load %arg2[%188, %c0_48, %c0_49] : memref<8x8x128xbf16, #tpu.memory_space<vmem>>, vector<1x8x128xbf16>
    %190 = vector.shape_cast %189 : vector<1x8x128xbf16> to vector<8x128xbf16>
    %191 = arith.extf %190 : vector<8x128xbf16> to vector<8x128xf32>
    %cst_50 = arith.constant dense<0.000000e+00> : vector<8x128xf32>
    %192 = tpu.matmul %182, %3, %cst_50 {dimension_numbers = #tpu.dot_dimension_numbers<[1], [0], [0], [1], [0, 0, 1, 1], [], []>} : vector<8x32xf32>, vector<32x128xf32>, vector<8x128xf32> -> vector<8x128xf32>
    %193 = arith.addf %191, %192 : vector<8x128xf32>
    %194 = arith.negf %193 : vector<8x128xf32>
    %195 = math.exp %194 : vector<8x128xf32>
    %cst_51 = arith.constant 1.000000e+00 : f32
    %196 = vector.broadcast %cst_51 : f32 to vector<8x128xf32>
    %197 = arith.addf %196, %195 : vector<8x128xf32>
    %198 = arith.divf %196, %197 : vector<8x128xf32>
    %199 = math.tanh %193 : vector<8x128xf32>
    %200 = vector.extract_strided_slice %198 {offsets = [0, 0], sizes = [8, 32], strides = [1, 1]} : vector<8x128xf32> to vector<8x32xf32>
    %201 = vector.extract_strided_slice %198 {offsets = [0, 32], sizes = [8, 32], strides = [1, 1]} : vector<8x128xf32> to vector<8x32xf32>
    %202 = vector.extract_strided_slice %199 {offsets = [0, 64], sizes = [8, 32], strides = [1, 1]} : vector<8x128xf32> to vector<8x32xf32>
    %203 = vector.extract_strided_slice %198 {offsets = [0, 96], sizes = [8, 32], strides = [1, 1]} : vector<8x128xf32> to vector<8x32xf32>
    %204 = arith.mulf %201, %180 : vector<8x32xf32>
    %205 = arith.mulf %200, %202 : vector<8x32xf32>
    %206 = arith.addf %204, %205 : vector<8x32xf32>
    %207 = math.tanh %206 : vector<8x32xf32>
    %208 = arith.mulf %203, %207 : vector<8x32xf32>
    %209 = arith.truncf %208 : vector<8x32xf32> to vector<8x32xbf16>
    %210 = arith.index_cast %c7_i32 : i32 to index
    %c0_52 = arith.constant 0 : index
    %c0_53 = arith.constant 0 : index
    %211 = vector.load %arg4[%210, %c0_52, %c0_53] : memref<8x8x32xbf16, #tpu.memory_space<vmem>>, vector<1x8x32xbf16>
    %212 = vector.shape_cast %211 : vector<1x8x32xbf16> to vector<8x32xbf16>
    %213 = vector.shape_cast %209 : vector<8x32xbf16> to vector<1x8x32xbf16>
    tpu.vector_store %arg4[%210, %c0_52, %c0_53], %213 {strides = array<i32>} : memref<8x8x32xbf16, #tpu.memory_space<vmem>>, vector<1x8x32xbf16>,
    %c8_i32 = arith.constant 8 : i32
    %c0_54 = arith.constant 0 : index
    %c0_55 = arith.constant 0 : index
    %214 = vector.load %arg5[%c0_54, %c0_55] : memref<8x32xf32, #tpu.memory_space<vmem>>, vector<8x32xf32>
    tpu.vector_store %arg5[%c0_54, %c0_55], %208 {strides = array<i32>} : memref<8x32xf32, #tpu.memory_space<vmem>>, vector<8x32xf32>,
    %c0_56 = arith.constant 0 : index
    %c0_57 = arith.constant 0 : index
    %215 = vector.load %arg6[%c0_56, %c0_57] : memref<8x32xf32, #tpu.memory_space<vmem>>, vector<8x32xf32>
    tpu.vector_store %arg6[%c0_56, %c0_57], %206 {strides = array<i32>} : memref<8x32xf32, #tpu.memory_space<vmem>>, vector<8x32xf32>,
    return
  }
  func.func @transform_0(%arg0: i32, %arg1: i32) -> (i32, i32, i32) {
    %c0_i32 = arith.constant 0 : i32
    %c0_i32_0 = arith.constant 0 : i32
    return %arg1, %arg0, %c0_i32 : i32, i32, i32
  }
  func.func @transform_1(%arg0: i32, %arg1: i32) -> (i32, i32) {
    %c0_i32 = arith.constant 0 : i32
    %c0_i32_0 = arith.constant 0 : i32
    %c0_i32_1 = arith.constant 0 : i32
    return %c0_i32, %c0_i32_0 : i32, i32
  }
  func.func @transform_2(%arg0: i32, %arg1: i32) -> (i32, i32, i32) {
    %c0_i32 = arith.constant 0 : i32
    %c0_i32_0 = arith.constant 0 : i32
    return %arg1, %arg0, %c0_i32 : i32, i32, i32
  }
}

</mosaic_0001>

<bundles_post_ra>
// kernel: etc_lstm_forward.1
= control target key start
LH: loop header
LB: loop body
LE: loop exit
PB: predicated region body
PF: predicated region fallthrough
CT: control target
= control target key end

     0   :  { %vm15_vm0 = vcmask 261120   ;;  %v1179_v0 = vmov 0.0   ;;  %vm1180_vm1 = vmmov 0   ;;  %s1181_s18 = smov 64   ;;  %s1182_s19 = smov 32   ;;  %vm136_vm2 = vcmask 257024   ;;  %s1428_s1 = inlined_call_operand.vmem [shape: f32[32,128], index: 1, kind: input, shape index: {}]   ;;  %s1429_s0 = inlined_call_operand.vmem [shape: bf16[8,8,128], index: 0, kind: input, shape index: {}]   ;;  %s1430_s2 = inlined_call_operand.vmem [shape: bf16[8,8,32], index: 2, kind: output, shape index: {}]  }
   0x1   :  { %1022 = vmatprep.subr.mxu0 %v1179_v0  ;;  %v1203_v1 = vld [vmem:[%s1428_s1 + $0x18] sm:$0xff]  ;;  %v1208_v2 = vld [vmem:[%s1428_s1 + $0x10] sm:$0xff]  ;;  %1030 = vmatprep.mubr.msk.f32.mxu0 %vm1180_vm1, %v1179_v0  ;;  %16 = vst.msk [vmem:[#allocation2] sm:$0xff] %vm15_vm0, %v1179_v0  ;;  %17 = vst.msk [vmem:[#allocation3] sm:$0xff] %vm15_vm0, %v1179_v0  ;;  %s1183_s9 = smov 96  }
   0x2   :  { %1023 = vmatpush3.msra.mxu0 %v1203_v1  ;;  %1033 = vmatprep.subr.mxu1 %v1179_v0  ;;  %v1222_v3 = vld [vmem:[%s1428_s1 + $0x8] sm:$0xff]  ;;  %v1231_v4 = vld [vmem:[%s1428_s1] sm:$0xff] }
   0x3   :  { %1024 = vmatprep.subr.mxu0 %v1179_v0  ;;  %1034 = vmatpush3.msra.mxu1 %v1203_v1  ;;  %v24_v6 = vld [vmem:[%s1429_s0] sm:$0xff]   ;;  %v944_v45 = vld [vmem:[%s1429_s0 + $0x8] sm:$0xff]  }
   0x4   :  { %1025 = vmatpush3.msra.mxu0 %v1208_v2  ;;  %1035 = vmatprep.subr.mxu1 %v1179_v0  ;;  %v25_v7 = vunpack.c.l.bf16 %v24_v6  ;;  %v140_v27 = vunpack.c.h.bf16 %v24_v6  ;;  %v252_v46 = vunpack.c.l.bf16 %v944_v45 }
   0x5   :  { %1026 = vmatprep.subr.mxu0 %v1179_v0  ;;  %1036 = vmatpush3.msra.mxu1 %v1208_v2 }
   0x6   :  { %1027 = vmatpush3.msra.mxu0 %v1222_v3  ;;  %1037 = vmatprep.subr.mxu1 %v1179_v0 }
   0x7   :  { %1028 = vmatprep.subr.mxu0 %v1179_v0  ;;  %1038 = vmatpush3.msra.mxu1 %v1222_v3 }
   0x8   :  { %1029 = vmatpush3.msra.mxu0 %v1231_v4  ;;  %v22_v5 = vld [vmem:[#allocation2] sm:$0xff]  ;;  %1039 = vmatprep.subr.mxu1 %v1179_v0  ;;  %v23_v12 = vld [vmem:[#allocation3] sm:$0xff] }
   0x9   :  { %1031 = vmatmul.mubr.msk.f32.vlgmr.msra.gmra.mxu0 %vm15_vm0, %v22_v5  ;;  %1040 = vmatpush3.msra.mxu1 %v1231_v4  ;;  %v364_v5 = vunpack.c.h.bf16 %v944_v45 }
   0xa   :  { %1041 = vmatprep.mubr.msk.f32.mxu1 %vm1180_vm1, %v1179_v0  ;;  %1044 = vmatprep.subr.mxu0 %v1179_v0 }
   0xb   :  { %1045 = vmatpush3.msra.mxu0 %v1203_v1  ;;  %1052 = vmatprep.mubr.msk.f32.mxu0 %vm1180_vm1, %v1179_v0 }
   0xc   :  { %1046 = vmatprep.subr.mxu0 %v1179_v0  ;;  %1055 = vmatprep.subr.mxu1 %v1179_v0 }
   0xd   :  { %1047 = vmatpush3.msra.mxu0 %v1208_v2 }
   0xe   :  { %1048 = vmatprep.subr.mxu0 %v1179_v0 }
   0xf   :  { %1049 = vmatpush3.msra.mxu0 %v1222_v3 }
  0x10   :  { %1050 = vmatprep.subr.mxu0 %v1179_v0 }
  0x11   :  { %1051 = vmatpush3.msra.mxu0 %v1231_v4 }
  0x12   :  { %1066 = vmatprep.subr.mxu0 %v1179_v0 }
  0xc9   :  { %v96_v8 = vpop.f32.mrf.mxu0 }
  0xca   :  { %v100_v9 = vadd.f32 %v96_v8, %v25_v7 }
  0xcb   :  { %v1032_v10 = vpop.f32.mrf.mxu0 }
  0xcc   :  { %1115 = vtanh.f32 %v100_v9  ;;  %v937_v13 = vmul.f32 -1.442695, %v100_v9 }
  0xce   :  { %1117 = vpow2.f32 %v937_v13 }
  0xd9   :  { %v1116_v11 = vpop.eup %1115 }
  0xda   :  { %114 = vrot.lane.b32.xlu0 %v1116_v11, %s1181_s18 }
  0xdb   :  { %v1118_v14 = vpop.eup %1117 }
  0xdc   :  { %v104_v15 = vadd.f32 1.0, %v1118_v14 }
  0xde   :  { %109 = vrot.lane.b32.xlu0 %v23_v12, %s1182_s19  ;;  %1119 = vrcp.f32 %v104_v15 }
  0xeb   :  { %v1120_v16 = vpop.eup %1119 }
 0x14c   :  { %v115_v17 = vpop.permute.xlu0 %114 }
 0x14d   :  { %v117_v18 = vmul.f32 %v1120_v16, %v115_v17 }
 0x14f   :  { %119 = vrot.lane.b32.xlu1 %v117_v18, %s1182_s19 }
 0x150   :  { %v110_v19 = vpop.permute.xlu0 %109 }
 0x151   :  { %v112_v20 = vmul.f32 %v1120_v16, %v110_v19 }
 0x1c1   :  { %v120_v21 = vpop.permute.xlu1 %119 }
 0x1c2   :  { %v122_v22 = vadd.f32 %v120_v21, %v112_v20 }
 0x1c4   :  { %1121 = vtanh.f32 %v122_v22 }
 0x1d1   :  { %v1122_v23 = vpop.eup %1121 }
 0x1d2   :  { %125 = vrot.lane.b32.xlu1 %v1122_v23, %s1181_s18  ;;  %v954_v23 = vld [vmem:[%s1429_s0 + $0x10] sm:$0xff]  }
 0x244   :  { %v126_v24 = vpop.permute.xlu1 %125 }
 0x245   :  { %v1263_v25 = vmul.f32 %v1120_v16, %v126_v24  ;;  %v476_v24 = vunpack.c.l.bf16 %v954_v23 }
 0x247   :  { %142 = vrot.lane.b32.xlu0 %v1263_v25, %s1182_s19 }
 0x2b9   :  { %v143_v26 = vpop.permute.xlu0 %142 }
 0x2ba   :  { %1042 = vmatmul.mubr.msk.f32.vlgmr.msra.gmra.mxu1 %vm15_vm0, %v143_v26 }
 0x2bb   :  { %1056 = vmatpush3.msra.mxu1 %v1203_v1  ;;  %1063 = vmatprep.mubr.msk.f32.mxu1 %vm1180_vm1, %v1179_v0 }
 0x2bc   :  { %1057 = vmatprep.subr.mxu1 %v1179_v0 }
 0x2bd   :  { %1058 = vmatpush3.msra.mxu1 %v1208_v2 }
 0x2be   :  { %1059 = vmatprep.subr.mxu1 %v1179_v0 }
 0x2bf   :  { %1060 = vmatpush3.msra.mxu1 %v1222_v3 }
 0x2c0   :  { %1061 = vmatprep.subr.mxu1 %v1179_v0 }
 0x2c1   :  { %1062 = vmatpush3.msra.mxu1 %v1231_v4 }
 0x2c2   :  { %1077 = vmatprep.subr.mxu1 %v1179_v0 }
 0x37a   :  { %v212_v28 = vpop.f32.mrf.mxu1 }
 0x37b   :  { %v216_v29 = vadd.f32 %v212_v28, %v140_v27 }
 0x37c   :  { %v1043_v30 = vpop.f32.mrf.mxu1 }
 0x37d   :  { %1123 = vtanh.f32 %v216_v29  ;;  %v941_v32 = vmul.f32 -1.442695, %v216_v29 }
 0x37f   :  { %1125 = vpow2.f32 %v941_v32 }
 0x38a   :  { %v1124_v31 = vpop.eup %1123 }
 0x38b   :  { %226 = vrot.lane.b32.xlu1 %v1124_v31, %s1181_s18 }
 0x38c   :  { %v1126_v33 = vpop.eup %1125 }
 0x38d   :  { %v220_v34 = vadd.f32 1.0, %v1126_v33 }
 0x38f   :  { %1127 = vrcp.f32 %v220_v34 }
 0x39c   :  { %v1128_v35 = vpop.eup %1127 }
 0x39d   :  { %v224_v38 = vmul.f32 %v1128_v35, %v122_v22 }
 0x3fd   :  { %v227_v36 = vpop.permute.xlu1 %226 }
 0x3fe   :  { %v229_v37 = vmul.f32 %v1128_v35, %v227_v36 }
 0x400   :  { %231 = vrot.lane.b32.xlu0 %v229_v37, %s1182_s19 }
 0x472   :  { %v232_v39 = vpop.permute.xlu0 %231 }
 0x473   :  { %v234_v40 = vadd.f32 %v232_v39, %v224_v38 }
 0x475   :  { %1129 = vtanh.f32 %v234_v40 }
 0x482   :  { %v1130_v41 = vpop.eup %1129 }
 0x483   :  { %237 = vrot.lane.b32.xlu1 %v1130_v41, %s1181_s18 }
 0x4f5   :  { %v238_v42 = vpop.permute.xlu1 %237 }
 0x4f6   :  { %v1281_v43 = vmul.f32 %v1128_v35, %v238_v42 }
 0x4f8   :  { %254 = vrot.lane.b32.xlu0 %v1281_v43, %s1182_s19 }
 0x56a   :  { %v255_v44 = vpop.permute.xlu0 %254 }
 0x56b   :  { %1053 = vmatmul.mubr.msk.f32.vlgmr.msra.gmra.mxu0 %vm15_vm0, %v255_v44  ;;  %v588_v44 = vunpack.c.h.bf16 %v954_v23 }
 0x56c   :  { %1067 = vmatpush3.msra.mxu0 %v1203_v1  ;;  %1074 = vmatprep.mubr.msk.f32.mxu0 %vm1180_vm1, %v1179_v0 }
 0x56d   :  { %1068 = vmatprep.subr.mxu0 %v1179_v0 }
 0x56e   :  { %1069 = vmatpush3.msra.mxu0 %v1208_v2 }
 0x56f   :  { %1070 = vmatprep.subr.mxu0 %v1179_v0 }
 0x570   :  { %1071 = vmatpush3.msra.mxu0 %v1222_v3 }
 0x571   :  { %1072 = vmatprep.subr.mxu0 %v1179_v0 }
 0x572   :  { %1073 = vmatpush3.msra.mxu0 %v1231_v4 }
 0x573   :  { %1088 = vmatprep.subr.mxu0 %v1179_v0 }
 0x62b   :  { %v324_v47 = vpop.f32.mrf.mxu0 }
 0x62c   :  { %v328_v48 = vadd.f32 %v324_v47, %v252_v46 }
 0x62d   :  { %v1054_v49 = vpop.f32.mrf.mxu0 }
 0x62e   :  { %1131 = vtanh.f32 %v328_v48  ;;  %v946_v51 = vmul.f32 -1.442695, %v328_v48 }
 0x630   :  { %1133 = vpow2.f32 %v946_v51 }
 0x63b   :  { %v1132_v50 = vpop.eup %1131 }
 0x63c   :  { %338 = vrot.lane.b32.xlu1 %v1132_v50, %s1181_s18 }
 0x63d   :  { %v1134_v52 = vpop.eup %1133 }
 0x63e   :  { %v332_v53 = vadd.f32 1.0, %v1134_v52 }
 0x640   :  { %1135 = vrcp.f32 %v332_v53 }
 0x64d   :  { %v1136_v54 = vpop.eup %1135 }
 0x64e   :  { %v336_v57 = vmul.f32 %v1136_v54, %v234_v40 }
 0x6ae   :  { %v339_v55 = vpop.permute.xlu1 %338 }
 0x6af   :  { %v341_v56 = vmul.f32 %v1136_v54, %v339_v55 }
 0x6b1   :  { %343 = vrot.lane.b32.xlu0 %v341_v56, %s1182_s19 }
 0x723   :  { %v344_v58 = vpop.permute.xlu0 %343 }
 0x724   :  { %v346_v59 = vadd.f32 %v344_v58, %v336_v57  ;;  %v964_v57 = vld [vmem:[%s1429_s0 + $0x18] sm:$0xff]  }
 0x725   :  { %v700_v58 = vunpack.c.l.bf16 %v964_v57 }
 0x726   :  { %1137 = vtanh.f32 %v346_v59 }
 0x733   :  { %v1138_v60 = vpop.eup %1137 }
 0x734   :  { %349 = vrot.lane.b32.xlu1 %v1138_v60, %s1181_s18 }
 0x7a6   :  { %v350_v61 = vpop.permute.xlu1 %349 }
 0x7a7   :  { %v1302_v62 = vmul.f32 %v1136_v54, %v350_v61 }
 0x7a9   :  { %366 = vrot.lane.b32.xlu0 %v1302_v62, %s1182_s19 }
 0x81b   :  { %v367_v63 = vpop.permute.xlu0 %366 }
 0x81c   :  { %1064 = vmatmul.mubr.msk.f32.vlgmr.msra.gmra.mxu1 %vm15_vm0, %v367_v63 }
 0x81d   :  { %1078 = vmatpush3.msra.mxu1 %v1203_v1  ;;  %1085 = vmatprep.mubr.msk.f32.mxu1 %vm1180_vm1, %v1179_v0 }
 0x81e   :  { %1079 = vmatprep.subr.mxu1 %v1179_v0 }
 0x81f   :  { %1080 = vmatpush3.msra.mxu1 %v1208_v2 }
 0x820   :  { %1081 = vmatprep.subr.mxu1 %v1179_v0 }
 0x821   :  { %1082 = vmatpush3.msra.mxu1 %v1222_v3 }
 0x822   :  { %1083 = vmatprep.subr.mxu1 %v1179_v0 }
 0x823   :  { %1084 = vmatpush3.msra.mxu1 %v1231_v4 }
 0x824   :  { %1099 = vmatprep.subr.mxu1 %v1179_v0 }
 0x8dc   :  { %v436_v6 = vpop.f32.mrf.mxu1 }
 0x8dd   :  { %v440_v7 = vadd.f32 %v436_v6, %v364_v5 }
 0x8de   :  { %v1065_v8 = vpop.f32.mrf.mxu1 }
 0x8df   :  { %1139 = vtanh.f32 %v440_v7  ;;  %v951_v10 = vmul.f32 -1.442695, %v440_v7 }
 0x8e1   :  { %1141 = vpow2.f32 %v951_v10 }
 0x8ec   :  { %v1140_v9 = vpop.eup %1139 }
 0x8ed   :  { %450 = vrot.lane.b32.xlu1 %v1140_v9, %s1181_s18 }
 0x8ee   :  { %v1142_v11 = vpop.eup %1141 }
 0x8ef   :  { %v444_v12 = vadd.f32 1.0, %v1142_v11 }
 0x8f1   :  { %1143 = vrcp.f32 %v444_v12 }
 0x8fe   :  { %v1144_v13 = vpop.eup %1143 }
 0x8ff   :  { %v448_v16 = vmul.f32 %v1144_v13, %v346_v59 }
 0x95f   :  { %v451_v14 = vpop.permute.xlu1 %450 }
 0x960   :  { %v453_v15 = vmul.f32 %v1144_v13, %v451_v14 }
 0x962   :  { %455 = vrot.lane.b32.xlu0 %v453_v15, %s1182_s19 }
 0x9d4   :  { %v456_v17 = vpop.permute.xlu0 %455 }
 0x9d5   :  { %v458_v18 = vadd.f32 %v456_v17, %v448_v16 }
 0x9d7   :  { %1145 = vtanh.f32 %v458_v18 }
 0x9e4   :  { %v1146_v19 = vpop.eup %1145 }
 0x9e5   :  { %461 = vrot.lane.b32.xlu1 %v1146_v19, %s1181_s18 }
 0xa57   :  { %v462_v20 = vpop.permute.xlu1 %461 }
 0xa58   :  { %v1320_v21 = vmul.f32 %v1144_v13, %v462_v20 }
 0xa5a   :  { %478 = vrot.lane.b32.xlu0 %v1320_v21, %s1182_s19 }
 0xacc   :  { %v479_v22 = vpop.permute.xlu0 %478 }
 0xacd   :  { %1075 = vmatmul.mubr.msk.f32.vlgmr.msra.gmra.mxu0 %vm15_vm0, %v479_v22 }
 0xace   :  { %1089 = vmatpush3.msra.mxu0 %v1203_v1  ;;  %1096 = vmatprep.mubr.msk.f32.mxu0 %vm1180_vm1, %v1179_v0 }
 0xacf   :  { %1090 = vmatprep.subr.mxu0 %v1179_v0 }
 0xad0   :  { %1091 = vmatpush3.msra.mxu0 %v1208_v2 }
 0xad1   :  { %1092 = vmatprep.subr.mxu0 %v1179_v0 }
 0xad2   :  { %1093 = vmatpush3.msra.mxu0 %v1222_v3 }
 0xad3   :  { %1094 = vmatprep.subr.mxu0 %v1179_v0 }
 0xad4   :  { %1095 = vmatpush3.msra.mxu0 %v1231_v4 }
 0xb8d   :  { %v548_v26 = vpop.f32.mrf.mxu0 }
 0xb8e   :  { %v552_v27 = vadd.f32 %v548_v26, %v476_v24 }
 0xb8f   :  { %v1076_v28 = vpop.f32.mrf.mxu0 }
 0xb90   :  { %1147 = vtanh.f32 %v552_v27  ;;  %v956_v30 = vmul.f32 -1.442695, %v552_v27 }
 0xb92   :  { %1149 = vpow2.f32 %v956_v30 }
 0xb9d   :  { %v1148_v29 = vpop.eup %1147 }
 0xb9e   :  { %562 = vrot.lane.b32.xlu1 %v1148_v29, %s1181_s18 }
 0xb9f   :  { %v1150_v31 = vpop.eup %1149 }
 0xba0   :  { %v556_v32 = vadd.f32 1.0, %v1150_v31  ;;  %v974_v31 = vpack.c.bf16 %v1263_v25, %v1263_v25 }
 0xba2   :  { %1151 = vrcp.f32 %v556_v32  ;;  %v976_v32 = vpack.c.bf16 %v1302_v62, %v1302_v62 }
 0xbaf   :  { %v1152_v33 = vpop.eup %1151 }
 0xbb0   :  { %v560_v36 = vmul.f32 %v1152_v33, %v458_v18  ;;  %v812_v18 = vunpack.c.h.bf16 %v964_v57 }
 0xc10   :  { %v563_v34 = vpop.permute.xlu1 %562 }
 0xc11   :  { %v565_v35 = vmul.f32 %v1152_v33, %v563_v34 }
 0xc13   :  { %567 = vrot.lane.b32.xlu0 %v565_v35, %s1182_s19 }
 0xc85   :  { %v568_v37 = vpop.permute.xlu0 %567 }
 0xc86   :  { %v570_v38 = vadd.f32 %v568_v37, %v560_v36 }
 0xc88   :  { %1153 = vtanh.f32 %v570_v38 }
 0xc95   :  { %v1154_v39 = vpop.eup %1153 }
 0xc96   :  { %573 = vrot.lane.b32.xlu1 %v1154_v39, %s1181_s18 }
 0xd08   :  { %v574_v40 = vpop.permute.xlu1 %573 }
 0xd09   :  { %v1340_v41 = vmul.f32 %v1152_v33, %v574_v40 }
 0xd0b   :  { %590 = vrot.lane.b32.xlu0 %v1340_v41, %s1182_s19  ;;  %v978_v33 = vpack.c.bf16 %v1340_v41, %v1340_v41  ;;  %v975_v41 = vpack.c.bf16 %v1281_v43, %v1281_v43 }
 0xd7d   :  { %v591_v42 = vpop.permute.xlu0 %590 }
 0xd7e   :  { %1086 = vmatmul.mubr.msk.f32.vlgmr.msra.gmra.mxu1 %vm15_vm0, %v591_v42  ;;  %v977_v42 = vpack.c.bf16 %v1320_v21, %v1320_v21 }
 0xd7f   :  { %1100 = vmatpush3.msra.mxu1 %v1203_v1  ;;  %1107 = vmatprep.mubr.msk.f32.mxu1 %vm1180_vm1, %v1179_v0 }
 0xd80   :  { %1101 = vmatprep.subr.mxu1 %v1179_v0 }
 0xd81   :  { %1102 = vmatpush3.msra.mxu1 %v1208_v2 }
 0xd82   :  { %1103 = vmatprep.subr.mxu1 %v1179_v0 }
 0xd83   :  { %1104 = vmatpush3.msra.mxu1 %v1222_v3 }
 0xd84   :  { %1105 = vmatprep.subr.mxu1 %v1179_v0 }
 0xd85   :  { %1106 = vmatpush3.msra.mxu1 %v1231_v4 }
 0xe3e   :  { %v660_v45 = vpop.f32.mrf.mxu1 }
 0xe3f   :  { %v664_v46 = vadd.f32 %v660_v45, %v588_v44 }
 0xe40   :  { %v1087_v47 = vpop.f32.mrf.mxu1 }
 0xe41   :  { %1155 = vtanh.f32 %v664_v46  ;;  %v961_v48 = vmul.f32 -1.442695, %v664_v46 }
 0xe43   :  { %1157 = vpow2.f32 %v961_v48 }
 0xe4e   :  { %v1156_v1 = vpop.eup %1155 }
 0xe4f   :  { %674 = vrot.lane.b32.xlu1 %v1156_v1, %s1181_s18 }
 0xe50   :  { %v1158_v49 = vpop.eup %1157 }
 0xe51   :  { %v668_v2 = vadd.f32 1.0, %v1158_v49 }
 0xe53   :  { %1159 = vrcp.f32 %v668_v2 }
 0xe60   :  { %v1160_v50 = vpop.eup %1159 }
 0xe61   :  { %v672_v0 = vmul.f32 %v1160_v50, %v570_v38 }
 0xec1   :  { %v675_v51 = vpop.permute.xlu1 %674 }
 0xec2   :  { %v677_v3 = vmul.f32 %v1160_v50, %v675_v51 }
 0xec4   :  { %679 = vrot.lane.b32.xlu0 %v677_v3, %s1182_s19 }
 0xf36   :  { %v680_v4 = vpop.permute.xlu0 %679 }
 0xf37   :  { %v682_v52 = vadd.f32 %v680_v4, %v672_v0 }
 0xf39   :  { %1161 = vtanh.f32 %v682_v52 }
 0xf46   :  { %v1162_v53 = vpop.eup %1161 }
 0xf47   :  { %685 = vrot.lane.b32.xlu1 %v1162_v53, %s1181_s18 }
 0xfb9   :  { %v686_v54 = vpop.permute.xlu1 %685 }
 0xfba   :  { %v1357_v55 = vmul.f32 %v1160_v50, %v686_v54 }
 0xfbc   :  { %702 = vrot.lane.b32.xlu0 %v1357_v55, %s1182_s19  ;;  %v979_v44 = vpack.c.bf16 %v1357_v55, %v1357_v55 }
0x102e   :  { %v703_v56 = vpop.permute.xlu0 %702 }
0x102f   :  { %1097 = vmatmul.mubr.msk.f32.vlgmr.msra.gmra.mxu0 %vm15_vm0, %v703_v56 }
0x10ef   :  { %v772_v59 = vpop.f32.mrf.mxu0 }
0x10f0   :  { %v776_v60 = vadd.f32 %v772_v59, %v700_v58 }
0x10f1   :  { %v1098_v61 = vpop.f32.mrf.mxu0 }
0x10f2   :  { %1163 = vtanh.f32 %v776_v60  ;;  %v966_v5 = vmul.f32 -1.442695, %v776_v60 }
0x10f4   :  { %1165 = vpow2.f32 %v966_v5 }
0x10ff   :  { %v1164_v63 = vpop.eup %1163 }
0x1100   :  { %786 = vrot.lane.b32.xlu1 %v1164_v63, %s1181_s18 }
0x1101   :  { %v1166_v6 = vpop.eup %1165 }
0x1102   :  { %v780_v7 = vadd.f32 1.0, %v1166_v6 }
0x1104   :  { %1167 = vrcp.f32 %v780_v7 }
0x1111   :  { %v1168_v8 = vpop.eup %1167 }
0x1112   :  { %v784_v11 = vmul.f32 %v1168_v8, %v682_v52 }
0x1172   :  { %v787_v9 = vpop.permute.xlu1 %786 }
0x1173   :  { %v789_v10 = vmul.f32 %v1168_v8, %v787_v9 }
0x1175   :  { %791 = vrot.lane.b32.xlu0 %v789_v10, %s1182_s19 }
0x11e7   :  { %v792_v12 = vpop.permute.xlu0 %791 }
0x11e8   :  { %v794_v13 = vadd.f32 %v792_v12, %v784_v11 }
0x11ea   :  { %1169 = vtanh.f32 %v794_v13 }
0x11f7   :  { %v1170_v14 = vpop.eup %1169 }
0x11f8   :  { %797 = vrot.lane.b32.xlu1 %v1170_v14, %s1181_s18 }
0x126a   :  { %v798_v15 = vpop.permute.xlu1 %797 }
0x126b   :  { %v800_v16 = vmul.f32 %v1168_v8, %v798_v15 }
0x126d   :  { %814 = vrot.lane.b32.xlu0 %v800_v16, %s1182_s19  ;;  %v980_v34 = vpack.c.bf16 %v800_v16, %v800_v16 }
0x12df   :  { %v815_v17 = vpop.permute.xlu0 %814 }
0x12e0   :  { %1108 = vmatmul.mubr.msk.f32.vlgmr.msra.gmra.mxu1 %vm15_vm0, %v815_v17 }
0x13a0   :  { %v884_v19 = vpop.f32.mrf.mxu1 }
0x13a1   :  { %v888_v20 = vadd.f32 %v884_v19, %v812_v18 }
0x13a2   :  { %v1109_v22 = vpop.f32.mrf.mxu1 }
0x13a3   :  { %1171 = vtanh.f32 %v888_v20  ;;  %v971_v24 = vmul.f32 -1.442695, %v888_v20 }
0x13a5   :  { %1173 = vpow2.f32 %v971_v24 }
0x13b0   :  { %v1172_v23 = vpop.eup %1171 }
0x13b1   :  { %898 = vrot.lane.b32.xlu1 %v1172_v23, %s1181_s18 }
0x13b2   :  { %v1174_v26 = vpop.eup %1173 }
0x13b3   :  { %v892_v27 = vadd.f32 1.0, %v1174_v26 }
0x13b5   :  { %1175 = vrcp.f32 %v892_v27 }
0x13c2   :  { %v1176_v28 = vpop.eup %1175 }
0x13c3   :  { %v896_v35 = vmul.f32 %v1176_v28, %v794_v13 }
0x1423   :  { %v899_v29 = vpop.permute.xlu1 %898 }
0x1424   :  { %v901_v30 = vmul.f32 %v1176_v28, %v899_v29 }
0x1426   :  { %903 = vrot.lane.b32.xlu0 %v901_v30, %s1182_s19 }
0x142a   :  { %133 = vrot.lane.b32.xlu0 %v974_v31, %s1182_s19 }
0x142e   :  { %357 = vrot.lane.b32.xlu0 %v976_v32, %s1182_s19 }
0x1432   :  { %581 = vrot.lane.b32.xlu0 %v978_v33, %s1182_s19 }
0x1436   :  { %805 = vrot.lane.b32.xlu0 %v980_v34, %s1182_s19 }
0x1498   :  { %v904_v36 = vpop.permute.xlu0 %903 }
0x1499   :  { %v906_v37 = vadd.f32 %v904_v36, %v896_v35 }
0x149b   :  { %1177 = vtanh.f32 %v906_v37 }
0x149c   :  { %v134_v25 = vpop.permute.xlu0 %133 }
0x149d   :  { %137 = vst.msk [vmem:[%s1430_s2] sm:$0xf] %vm136_vm2, %v134_v25 }
0x14a0   :  { %v358_v62 = vpop.permute.xlu0 %357 }
0x14a1   :  { %948 = vst.msk [vmem:[%s1430_s2 + $0x8] sm:$0xf] %vm136_vm2, %v358_v62 }
0x14a4   :  { %v582_v38 = vpop.permute.xlu0 %581 }
0x14a5   :  { %958 = vst.msk [vmem:[%s1430_s2 + $0x10] sm:$0xf] %vm136_vm2, %v582_v38 }
0x14a8   :  { %v1178_v39 = vpop.eup %1177  ;;  %v806_v40 = vpop.permute.xlu0 %805 }
0x14a9   :  { %968 = vst.msk [vmem:[%s1430_s2 + $0x18] sm:$0xf] %vm136_vm2, %v806_v40  ;;  %909 = vrot.lane.b32.xlu1 %v1178_v39, %s1181_s18 }
0x14ad   :  { %245 = vrot.lane.b32.xlu1 %v975_v41, %s1182_s19 }
0x14b1   :  { %469 = vrot.lane.b32.xlu1 %v977_v42, %s1182_s19 }
0x14b5   :  { %693 = vrot.lane.b32.xlu1 %v979_v44, %s1182_s19 }
0x151b   :  { %v910_v45 = vpop.permute.xlu1 %909 }
0x151c   :  { %v912_v46 = vmul.f32 %v1176_v28, %v910_v45 }
0x151e   :  { %v981_v47 = vpack.c.bf16 %v912_v46, %v912_v46  ;;  %923 = vrot.lane.b32.xlu0 %v912_v46, %s1182_s19 }
0x151f   :  { %v246_v1 = vpop.permute.xlu1 %245 }
0x1520   :  { %943 = vst.msk [vmem:[%s1430_s2 + $0x4] sm:$0xf] %vm136_vm2, %v246_v1  ;;  %917 = vrot.lane.b32.xlu1 %v981_v47, %s1182_s19 }
0x1523   :  { %v470_v43 = vpop.permute.xlu1 %469 }
0x1524   :  { %953 = vst.msk [vmem:[%s1430_s2 + $0xc] sm:$0xf] %vm136_vm2, %v470_v43  ;;  %928 = vrot.lane.b32.xlu1 %v906_v37, %s1183_s9 }
0x1527   :  { %v694_v21 = vpop.permute.xlu1 %693 }
0x1528   :  { %963 = vst.msk [vmem:[%s1430_s2 + $0x14] sm:$0xf] %vm136_vm2, %v694_v21 }
0x1590   :  { %v924_v48 = vpop.permute.xlu0 %923 }
0x1591   :  { %926 = vst.msk [vmem:[#allocation2] sm:$0xff] %vm15_vm0, %v924_v48 }
0x1592   :  { %v918_v49 = vpop.permute.xlu1 %917 }
0x1593   :  { %973 = vst.msk [vmem:[%s1430_s2 + $0x1c] sm:$0xf] %vm136_vm2, %v918_v49 }
0x1596   :  { %v929_v2 = vpop.permute.xlu1 %928 }
0x1597   :  { %931 = vst.msk [vmem:[#allocation3] sm:$0xff] %vm15_vm0, %v929_v2 }

</bundles_post_ra>
